<compile_context>
chip_gen: v7x
topology: tpu7x:2x2x1
jax: 0.10.0
libtpu: 0.0.40
codegen_flags: <defaults>
</compile_context>

<pallas_src>
import functools

import jax
import jax.numpy as jnp
from jax.experimental import pallas as pl
from jax.experimental.pallas import tpu as pltpu

IN_F = 10    # net1 in_features
HID_F = 10   # net1 out_features / net2 in_features
OUT_F = 5    # net2 out_features
PACK = 4     # samples packed per lane-column (kills the sublane-padding waste)


def mlp_kernel(xT_ref, w1_ref, b1_ref, w2_ref, b2_ref, o_ref):
    # xT_ref: (PACK*IN_F, TB) feature-major tile; batch rides the 128-lane axis.
    # net1 (block-diagonal): W1b @ X + b1b, then ReLU.
    h = jnp.dot(w1_ref[...], xT_ref[...], preferred_element_type=jnp.float32)
    h = jnp.maximum(h + b1_ref[...], 0.0)
    # net2 (block-diagonal): W2b @ H + b2b.
    out = jnp.dot(w2_ref[...], h, preferred_element_type=jnp.float32)
    o_ref[...] = (out + b2_ref[...]).astype(o_ref.dtype)


def _round_up(x, m):
    return ((x + m - 1) // m) * m


def prepare_params(w1, b1, w2, b2):
    """Hoisted out of the forward hot path.

    PyTorch layout in: w1 (10,10), b1 (10,), w2 (5,10), b2 (5,).
    Builds block-diagonal weights so PACK independent samples share one packed
    lane-column, plus column-vector biases tiled PACK times.
    """
    def block_diag(w, n):
        o, i = w.shape
        wb = jnp.zeros((n * o, n * i), w.dtype)
        for k in range(n):
            wb = wb.at[k * o:(k + 1) * o, k * i:(k + 1) * i].set(w)
        return wb

    w1b = block_diag(w1, PACK)                  # (40, 40)
    w2b = block_diag(w2, PACK)                  # (20, 40)
    b1b = jnp.tile(b1, PACK).reshape(-1, 1)     # (40, 1)
    b2b = jnp.tile(b2, PACK).reshape(-1, 1)     # (20, 1)
    return w1b, b1b, w2b, b2b


@functools.partial(jax.jit, static_argnames=("tile_b",))
def toy_mp_forward(x, w1b, b1b, w2b, b2b, tile_b=49152):
    """x: (B, 10) f32 (PyTorch row-major batch). Returns (B, 5) f32."""
    B = x.shape[0]

    # ---- layout plumbing (fused by XLA under jit) ---------------------------
    B4 = _round_up(B, PACK)
    if B4 != B:                                 # tiny row pad only when B % 4 != 0
        x = jnp.pad(x, ((0, B4 - B), (0, 0)))
    Bp = B4 // PACK
    xT = x.reshape(Bp, PACK * IN_F).T           # (40, Bp): free reshape + one transpose pass

    # ---- batch tile: lane-aligned, big enough to hide per-step overhead,
    #      small enough to keep >=2 grid steps for dual-TC on v7x -------------
    tb_req = _round_up(max(int(tile_b), 128), 128)
    bp_ceil = _round_up(Bp, 128)
    TB = min(tb_req, bp_ceil)
    if bp_ceil >= 256:                          # keep at least 2 grid steps
        TB = min(TB, _round_up(pl.cdiv(bp_ceil, 2), 128))
    grid_b = pl.cdiv(Bp, TB)                    # ragged last block handled by Pallas

    outT = pl.pallas_call(
        mlp_kernel,
        out_shape=jax.ShapeDtypeStruct((PACK * OUT_F, Bp), jnp.float32),
        grid=(grid_b,),
        in_specs=[
            pl.BlockSpec((PACK * IN_F, TB), lambda i: (0, i)),            # x tile, pipelined
            pl.BlockSpec((PACK * HID_F, PACK * IN_F), lambda i: (0, 0)),  # W1b, VMEM-resident
            pl.BlockSpec((PACK * HID_F, 1), lambda i: (0, 0)),            # b1b
            pl.BlockSpec((PACK * OUT_F, PACK * HID_F), lambda i: (0, 0)), # W2b
            pl.BlockSpec((PACK * OUT_F, 1), lambda i: (0, 0)),            # b2b
        ],
        out_specs=pl.BlockSpec((PACK * OUT_F, TB), lambda i: (0, i)),
        compiler_params=pltpu.CompilerParams(
            dimension_semantics=("parallel",),  # dual-TC batch split on v7x
            vmem_limit_bytes=48 * 1024 * 1024,  # >16MiB v5e default, <64MiB v7x physical
        ),
    )(xT, w1b, b1b, w2b, b2b)

    # (20, Bp) -> (Bp, 20) -> (B4, 5) -> (B, 5); the reshape is free metadata.
    return outT.T.reshape(B4, OUT_F)[:B]


def init_params(key):
    """Deterministic params matching nn.Linear init ranges (U(-1/sqrt(fan_in), .))."""
    k1, k2, k3, k4 = jax.random.split(key, 4)
    bound1 = 1.0 / jnp.sqrt(10.0)
    w1 = jax.random.uniform(k1, (HID_F, IN_F), jnp.float32, -bound1, bound1)   # (out, in)
    b1 = jax.random.uniform(k2, (HID_F,), jnp.float32, -bound1, bound1)
    bound2 = 1.0 / jnp.sqrt(10.0)
    w2 = jax.random.uniform(k3, (OUT_F, HID_F), jnp.float32, -bound2, bound2)  # (out, in)
    b2 = jax.random.uniform(k4, (OUT_F,), jnp.float32, -bound2, bound2)
    return w1, b1, w2, b2


if __name__ == "__main__":
    # TODO(synk): dev0/dev1 placement + DDP process-group setup from the original
    # module is a distribution concern with no single-kernel equivalent; the
    # fused forward math is implemented here on one chip.
    key = jax.random.PRNGKey(0)
    kx, kp = jax.random.split(key)
    B = 8
    x = jax.random.normal(kx, (B, IN_F), jnp.float32)
    w1, b1, w2, b2 = init_params(kp)
    w1b, b1b, w2b, b2b = prepare_params(w1, b1, w2, b2)

    out = toy_mp_forward(x, w1b, b1b, w2b, b2b)
    out = jax.block_until_ready(out)

    # Reference in plain JAX (PyTorch semantics: y = x @ W.T + b).
    ref = jnp.maximum(x @ w1.T + b1, 0.0) @ w2.T + b2
    assert out.shape == (B, OUT_F)
    assert jnp.allclose(out, ref, atol=1e-5, rtol=1e-5), float(jnp.abs(out - ref).max())

    print("KERNEL_OK")
</pallas_src>

<mosaic_0001>
module attributes {stable_mosaic.version = 11 : i64} {
  func.func @mlp_kernel(%arg0: i32, %arg1: memref<40x128xf32, #tpu.memory_space<vmem>>, %arg2: memref<40x40xf32, #tpu.memory_space<vmem>>, %arg3: memref<40x1xf32, #tpu.memory_space<vmem>>, %arg4: memref<20x40xf32, #tpu.memory_space<vmem>>, %arg5: memref<20x1xf32, #tpu.memory_space<vmem>>, %arg6: memref<20x128xf32, #tpu.memory_space<vmem>>) attributes {dimension_semantics = [#tpu.dimension_semantics<parallel>], iteration_bounds = array<i64: 1>, scalar_prefetch = 0 : i64, scratch_operands = 0 : i64, tpu.core_type = #tpu.core_type<tc>, window_params = [{transform_indices = @transform_0, window_bounds = array<i64: 40, 128>}, {pipeline_mode = #tpu.pipeline_mode<synchronous>, transform_indices = @transform_1, window_bounds = array<i64: 40, 40>}, {pipeline_mode = #tpu.pipeline_mode<synchronous>, transform_indices = @transform_2, window_bounds = array<i64: 40, 1>}, {pipeline_mode = #tpu.pipeline_mode<synchronous>, transform_indices = @transform_3, window_bounds = array<i64: 20, 40>}, {pipeline_mode = #tpu.pipeline_mode<synchronous>, transform_indices = @transform_4, window_bounds = array<i64: 20, 1>}, {transform_indices = @transform_5, window_bounds = array<i64: 20, 128>}]} {
    %c0 = arith.constant 0 : index
    %c0_0 = arith.constant 0 : index
    %0 = vector.load %arg2[%c0, %c0_0] : memref<40x40xf32, #tpu.memory_space<vmem>>, vector<40x40xf32>
    %c0_1 = arith.constant 0 : index
    %c0_2 = arith.constant 0 : index
    %1 = vector.load %arg1[%c0_1, %c0_2] : memref<40x128xf32, #tpu.memory_space<vmem>>, vector<40x128xf32>
    %cst = arith.constant dense<0.000000e+00> : vector<40x128xf32>
    %2 = tpu.matmul %0, %1, %cst {dimension_numbers = #tpu.dot_dimension_numbers<[1], [0], [0], [1], [0, 0, 1, 1], [], []>} : vector<40x40xf32>, vector<40x128xf32>, vector<40x128xf32> -> vector<40x128xf32>
    %c0_3 = arith.constant 0 : index
    %c0_4 = arith.constant 0 : index
    %3 = vector.load %arg3[%c0_3, %c0_4] : memref<40x1xf32, #tpu.memory_space<vmem>>, vector<40x1xf32>
    %4 = vector.broadcast %3 : vector<40x1xf32> to vector<40x128xf32>
    %5 = arith.addf %2, %4 : vector<40x128xf32>
    %cst_5 = arith.constant 0.000000e+00 : f32
    %6 = vector.broadcast %cst_5 : f32 to vector<40x128xf32>
    %7 = arith.maximumf %5, %6 : vector<40x128xf32>
    %c0_6 = arith.constant 0 : index
    %c0_7 = arith.constant 0 : index
    %8 = vector.load %arg4[%c0_6, %c0_7] : memref<20x40xf32, #tpu.memory_space<vmem>>, vector<20x40xf32>
    %cst_8 = arith.constant dense<0.000000e+00> : vector<20x128xf32>
    %9 = tpu.matmul %8, %7, %cst_8 {dimension_numbers = #tpu.dot_dimension_numbers<[1], [0], [0], [1], [0, 0, 1, 1], [], []>} : vector<20x40xf32>, vector<40x128xf32>, vector<20x128xf32> -> vector<20x128xf32>
    %c0_9 = arith.constant 0 : index
    %c0_10 = arith.constant 0 : index
    %10 = vector.load %arg5[%c0_9, %c0_10] : memref<20x1xf32, #tpu.memory_space<vmem>>, vector<20x1xf32>
    %11 = vector.broadcast %10 : vector<20x1xf32> to vector<20x128xf32>
    %12 = arith.addf %9, %11 : vector<20x128xf32>
    %c0_11 = arith.constant 0 : index
    %c0_12 = arith.constant 0 : index
    %13 = vector.load %arg6[%c0_11, %c0_12] : memref<20x128xf32, #tpu.memory_space<vmem>>, vector<20x128xf32>
    tpu.vector_store %arg6[%c0_11, %c0_12], %12 {strides = array<i32>} : memref<20x128xf32, #tpu.memory_space<vmem>>, vector<20x128xf32>,
    return
  }
  func.func @transform_0(%arg0: i32) -> (i32, i32) {
    %c0_i32 = arith.constant 0 : i32
    %c0_i32_0 = arith.constant 0 : i32
    return %c0_i32, %arg0 : i32, i32
  }
  func.func @transform_1(%arg0: i32) -> (i32, i32) {
    %c0_i32 = arith.constant 0 : i32
    %c0_i32_0 = arith.constant 0 : i32
    %c0_i32_1 = arith.constant 0 : i32
    return %c0_i32, %c0_i32_0 : i32, i32
  }
  func.func @transform_2(%arg0: i32) -> (i32, i32) {
    %c0_i32 = arith.constant 0 : i32
    %c0_i32_0 = arith.constant 0 : i32
    %c0_i32_1 = arith.constant 0 : i32
    return %c0_i32, %c0_i32_0 : i32, i32
  }
  func.func @transform_3(%arg0: i32) -> (i32, i32) {
    %c0_i32 = arith.constant 0 : i32
    %c0_i32_0 = arith.constant 0 : i32
    %c0_i32_1 = arith.constant 0 : i32
    return %c0_i32, %c0_i32_0 : i32, i32
  }
  func.func @transform_4(%arg0: i32) -> (i32, i32) {
    %c0_i32 = arith.constant 0 : i32
    %c0_i32_0 = arith.constant 0 : i32
    %c0_i32_1 = arith.constant 0 : i32
    return %c0_i32, %c0_i32_0 : i32, i32
  }
  func.func @transform_5(%arg0: i32) -> (i32, i32) {
    %c0_i32 = arith.constant 0 : i32
    %c0_i32_0 = arith.constant 0 : i32
    return %c0_i32, %arg0 : i32, i32
  }
}

</mosaic_0001>

<bundles_post_ra>
// kernel: toy_mp_forward.1
= control target key start
LH: loop header
LB: loop body
LE: loop exit
PB: predicated region body
PF: predicated region fallthrough
CT: control target
= control target key end

     0   :  { %v376_v0 = vmov 0.0|0.0   ;;  %vm377_vm0 = vmmov 0   ;;  %v378_v4 = vmov 0.0   ;;  %v379_v7 = vmov 0   ;;  %s512_s0 = inlined_call_operand.vmem [shape: f32[40,2], index: 0, kind: input, shape index: {}]   ;;  %s513_s2 = inlined_call_operand.vmem [shape: f32[40,1], index: 2, kind: input, shape index: {}]   ;;  %s514_s1 = inlined_call_operand.vmem [shape: f32[40,40], index: 1, kind: input, shape index: {}]   ;;  %s515_s4 = inlined_call_operand.vmem [shape: f32[20,1], index: 4, kind: input, shape index: {}]   ;;  %s516_s3 = inlined_call_operand.vmem [shape: f32[20,40], index: 3, kind: input, shape index: {}]   ;;  %s517_s5 = inlined_call_operand.vmem [shape: f32[20,2], index: 5, kind: output, shape index: {}]  }
   0x1   :  { %358 = vmatprep.subr.bf16.mxu0 %v376_v0  ;;  %v25_v1 = vld [vmem:[%s512_s0] sm:$0xff]  ;;  %v26_v2 = vld [vmem:[%s512_s0 + $0x8] sm:$0xff]  ;;  %v27_v3 = vld [vmem:[%s512_s0 + $0x10] sm:$0xff]  ;;  %324 = vmatprep.mubr.msk.f32.mxu0 %vm377_vm0, %v378_v4  ;;  %vm60_vm1 = vcmask 326656  }
   0x2   :  { %v359_v5 = vpack.c.bf16 %v26_v2, %v25_v1  ;;  %v28_v6 = vld [vmem:[%s512_s0 + $0x18] sm:$0xff]  ;;  %374 = vset.pattern.permute.xlu0 %v379_v7  ;;  %375 = vset.pattern.permute.xlu1 %v379_v7  ;;  %v30_v9 = vld [vmem:[%s513_s2] sm:$0xff]  ;;  %v32_v10 = vld [vmem:[%s513_s2 + $0x10] sm:$0xff] }
   0x3   :  { %364 = vmatprep.subr.bf16.mxu1 %v376_v0  ;;  %349 = vmatprep.mubr.msk.f32.mxu1 %vm377_vm0, %v378_v4  ;;  %v362_v8 = vpack.c.bf16 %v28_v6, %v27_v3  ;;  %v31_v11 = vld [vmem:[%s513_s2 + $0x8] sm:$0xff]  ;;  %v33_v12 = vld [vmem:[%s513_s2 + $0x18] sm:$0xff]  ;;  %v29_v13 = vld [vmem:[%s512_s0 + $0x20] sm:$0xff] }
   0x4   :  { %360 = vmatpush3.bf16.msra.mxu0 %v359_v5  ;;  %37 = vperm.xlu0 %374, %v30_v9   ;;  %v20_v14 = vld [vmem:[%s514_s1] sm:$0xff]  ;;  %v21_v17 = vld [vmem:[%s514_s1 + $0x8] sm:$0xff]  ;;  %v176_v19 = vld [vmem:[%s515_s4 + $0x10] sm:$0xf] }
   0x5   :  { %361 = vmatprep.subr.bf16.mxu0 %v376_v0  ;;  %47 = vperm.xlu1 %375, %v32_v10   ;;  %v34_v15 = vld [vmem:[%s513_s2 + $0x20] sm:$0xff]  ;;  %v175_v18 = vld [vmem:[%s515_s4 + $0x8] sm:$0xff]  ;;  %v22_v20 = vld [vmem:[%s514_s1 + $0x10] sm:$0xff] }
   0x6   :  { %v174_v16 = vld [vmem:[%s515_s4] sm:$0xff]  ;;  %v23_v21 = vld [vmem:[%s514_s1 + $0x18] sm:$0xff]  ;;  %v172_v51 = vld [vmem:[%s516_s3 + $0x8] sm:$0xff] }
   0x7   :  { %v24_v22 = vld [vmem:[%s514_s1 + $0x20] sm:$0xff]  ;;  %v173_v52 = vld [vmem:[%s516_s3 + $0x10] sm:$0xf] }
   0x8   :  { %363 = vmatpush3.bf16.msra.mxu0 %v362_v8  ;;  %42 = vperm.xlu0 %374, %v31_v11   ;;  %v171_v50 = vld [vmem:[%s516_s3] sm:$0xff] }
   0x9   :  { %322 = vmatprep.subr.mxu0 %v378_v4  ;;  %52 = vperm.xlu1 %375, %v33_v12  }
   0xc   :  { %323 = vmatpush3.msra.mxu0 %v29_v13  ;;  %57 = vperm.xlu0 %374, %v34_v15  }
   0xd   :  { %325 = vmatmul.mubr.msk.f32.vlgmr.msra.gmra.mrb[0].mxu0 %vm60_vm1, %v20_v14  ;;  %179 = vperm.xlu1 %375, %v174_v16  }
   0xe   :  { %327 = vmatprep.mubr.msk.f32.mxu0 %vm377_vm0, %v378_v4 }
  0x10   :  { %184 = vperm.xlu0 %374, %v175_v18  }
  0x11   :  { %328 = vmatmul.mubr.msk.f32.gmra.mrb[2].mxu0 %vm60_vm1, %v21_v17  ;;  %189 = vperm.xlu1 %375, %v176_v19  }
  0x12   :  { %330 = vmatprep.mubr.msk.f32.mxu0 %vm377_vm0, %v378_v4 }
  0x15   :  { %331 = vmatmul.mubr.msk.f32.gmra.mrb[4].mxu0 %vm60_vm1, %v22_v20 }
  0x16   :  { %333 = vmatprep.mubr.msk.f32.mxu0 %vm377_vm0, %v378_v4 }
  0x19   :  { %334 = vmatmul.mubr.msk.f32.gmra.mrb[6].mxu0 %vm60_vm1, %v23_v21 }
  0x1a   :  { %336 = vmatprep.mubr.msk.f32.mxu0 %vm377_vm0, %v378_v4 }
  0x1d   :  { %337 = vmatmul.mubr.msk.f32.gmra.mrb[8].mxu0 %vm60_vm1, %v24_v22 }
  0x83   :  { %v38_v23 = vpop.permute.xlu0 %37 }
  0x84   :  { %v48_v31 = vpop.permute.xlu1 %47 }
  0x87   :  { %v43_v27 = vpop.permute.xlu0 %42 }
  0x88   :  { %v53_v38 = vpop.permute.xlu1 %52 }
  0x8b   :  { %v58_v44 = vpop.permute.xlu0 %57 }
  0x8c   :  { %v180_v53 = vpop.permute.xlu1 %179 }
  0x8f   :  { %v185_v57 = vpop.permute.xlu0 %184 }
  0x90   :  { %v190_v61 = vpop.permute.xlu1 %189 }
  0xe0   :  { %v142_v24 = vpop.f32.mrb[0].mxu0 }
  0xe1   :  { %v326_v25 = vpop.f32.mrb[1].mxu0  ;;  %v143_v26 = vadd.f32 %v142_v24, %v38_v23 }
  0xe3   :  { %v166_v32 = vmax.f32 %v143_v26, 0.0 }
  0xe4   :  { %v147_v28 = vpop.f32.mrb[2].mxu0 }
  0xe5   :  { %v148_v29 = vadd.f32 %v147_v28, %v43_v27  ;;  %v329_v30 = vpop.f32.mrb[3].mxu0 }
  0xe7   :  { %v167_v33 = vmax.f32 %v148_v29, 0.0 }
  0xe8   :  { %v152_v34 = vpop.f32.mrb[4].mxu0 }
  0xe9   :  { %v332_v35 = vpop.f32.mrb[5].mxu0  ;;  %v365_v36 = vpack.c.bf16 %v167_v33, %v166_v32  ;;  %v153_v37 = vadd.f32 %v152_v34, %v48_v31 }
  0xeb   :  { %366 = vmatpush3.bf16.msra.mxu1 %v365_v36  ;;  %v168_v42 = vmax.f32 %v153_v37, 0.0 }
  0xec   :  { %v157_v39 = vpop.f32.mrb[6].mxu0  ;;  %367 = vmatprep.subr.bf16.mxu1 %v376_v0 }
  0xed   :  { %v158_v40 = vadd.f32 %v157_v39, %v53_v38  ;;  %v335_v41 = vpop.f32.mrb[7].mxu0 }
  0xef   :  { %v169_v43 = vmax.f32 %v158_v40, 0.0 }
  0xf0   :  { %v162_v45 = vpop.f32.mrb[8].mxu0 }
  0xf1   :  { %v368_v46 = vpack.c.bf16 %v169_v43, %v168_v42  ;;  %v163_v47 = vadd.f32 %v162_v45, %v58_v44  ;;  %v338_v48 = vpop.f32.mrb[9].mxu0 }
  0xf3   :  { %369 = vmatpush3.bf16.msra.mxu1 %v368_v46  ;;  %v170_v49 = vmax.f32 %v163_v47, 0.0 }
  0xf4   :  { %347 = vmatprep.subr.mxu1 %v378_v4 }
  0xf7   :  { %348 = vmatpush3.msra.mxu1 %v170_v49 }
  0xf8   :  { %350 = vmatmul.mubr.msk.f32.vlgmr.msra.gmra.mrb[0].mxu1 %vm60_vm1, %v171_v50 }
  0xf9   :  { %352 = vmatprep.mubr.msk.f32.mxu1 %vm377_vm0, %v378_v4 }
  0xfc   :  { %353 = vmatmul.mubr.msk.f32.gmra.mrb[2].mxu1 %vm60_vm1, %v172_v51 }
  0xfd   :  { %355 = vmatprep.mubr.msk.f32.mxu1 %vm377_vm0, %v378_v4 }
 0x100   :  { %356 = vmatmul.mubr.msk.f32.gmra.mrb[4].mxu1 %vm60_vm1, %v173_v52 }
 0x1cb   :  { %v267_v54 = vpop.f32.mrb[0].mxu1 }
 0x1cc   :  { %v268_v55 = vadd.f32 %v267_v54, %v180_v53  ;;  %v351_v56 = vpop.f32.mrb[1].mxu1 }
 0x1ce   :  { %281 = vst [vmem:[%s517_s5] sm:$0xff] %v268_v55 }
 0x1cf   :  { %v272_v58 = vpop.f32.mrb[2].mxu1 }
 0x1d0   :  { %v273_v59 = vadd.f32 %v272_v58, %v185_v57  ;;  %v354_v60 = vpop.f32.mrb[3].mxu1 }
 0x1d2   :  { %282 = vst [vmem:[%s517_s5 + $0x8] sm:$0xff] %v273_v59 }
 0x1d3   :  { %v277_v62 = vpop.f32.mrb[4].mxu1 }
 0x1d4   :  { %v278_v63 = vadd.f32 %v277_v62, %v190_v61  ;;  %v357_v0 = vpop.f32.mrb[5].mxu1 }
 0x1d6   :  { %283 = vst [vmem:[%s517_s5 + $0x10] sm:$0xf] %v278_v63 }

</bundles_post_ra>
